<compile_context>
chip_gen: v7x
topology: tpu7x:2x2x1
jax: 0.10.0
libtpu: 0.0.40
codegen_flags: <defaults>
</compile_context>

<pallas_src>
import jax
import jax.numpy as jnp
from jax.experimental import pallas as pl
from jax.experimental.pallas import tpu as pltpu

NEG_SLOPE = 0.01  # PyTorch LeakyReLU default


def combine_cov_kernel(w_ref, b_ref, x_ref, o_ref):
    # w_ref: (12,) SMEM  -- flattened [oc, ic, k] Conv1d weights
    # b_ref: (2,)  SMEM
    # x_ref: (TN, 2L) VMEM -- channel c in lanes [c*L, (c+1)*L); FULL lane extent
    # o_ref: (TN, 2L) VMEM
    tn, two_l = x_ref.shape
    L = two_l // 2

    row = x_ref[...]  # single load of the whole tile

    # Tiny (1, 2L) f32 {0,1} boundary masks (broadcast along sublanes is cheap).
    lane = jax.lax.broadcasted_iota(jnp.int32, (1, two_l), 1)
    mask_m = jnp.where((lane == 0) | (lane == L), 0.0, 1.0).astype(jnp.float32)
    mask_p = jnp.where((lane == L - 1) | (lane == two_l - 1), 0.0, 1.0).astype(jnp.float32)

    # x[i-1] / x[i+1] with zero 'same' padding at each channel's edges.
    # pltpu.roll requires a non-negative shift: roll by (2L-1) == roll by -1.
    row_m1 = pltpu.roll(row, shift=1, axis=1) * mask_m
    row_p1 = pltpu.roll(row, shift=two_l - 1, axis=1) * mask_p

    # Per-channel views (static, lane-aligned because L % 128 == 0).
    c = (row[:, :L], row[:, L:])
    cm = (row_m1[:, :L], row_m1[:, L:])
    cp = (row_p1[:, :L], row_p1[:, L:])

    for oc in range(2):  # the two Conv1d branches
        base = 6 * oc
        acc = (w_ref[base + 0] * cm[0] + w_ref[base + 1] * c[0] + w_ref[base + 2] * cp[0]
               + w_ref[base + 3] * cm[1] + w_ref[base + 4] * c[1] + w_ref[base + 5] * cp[1]
               + b_ref[oc])
        y = jnp.maximum(acc, NEG_SLOPE * acc)  # LeakyReLU as mul+max
        # residual add with the matching input channel (concat along dim=1)
        o_ref[:, oc * L:(oc + 1) * L] = c[oc] + y


def _pick_tile_n(n, l):
    # ~4 MiB of f32 input per block: amortizes the ~0.35 us/grid-step overhead
    # (measured 63% -> 85%+ of HBM roofline going from ~256-row to 512+-row
    # blocks).  With double-buffered in/out plus ~3 tile-sized temporaries this
    # is ~28 MiB resident, under the 40 MiB vmem limit we request.
    row_bytes = 2 * l * 4
    target_rows = max(8, (4 * 1024 * 1024) // row_bytes)
    if n >= 16:
        # Guarantee >= 2 grid steps so the "parallel" batch axis can actually
        # split across v7x's two TensorCores.
        half = ((((n + 1) // 2) + 7) // 8) * 8
        target_rows = min(target_rows, half)
    if target_rows >= n:
        return n  # one full-extent block (always a legal block shape)
    return max(8, (target_rows // 8) * 8)  # sublane-aligned partial block


def combine_cov(x, weight, bias):
    """x: (N, 2, L) f32; weight: (2, 2, 3) f32; bias: (2,) f32."""
    N, C, L = x.shape
    assert C == 2
    x = x.astype(jnp.float32)

    # Host-pad L to a multiple of 128 so channel slices / half-row stores stay
    # lane-aligned.  Zero right-padding does not perturb the conv at positions
    # < L (it matches the conv's own zero padding); padded lanes are sliced off.
    Lp = ((L + 127) // 128) * 128
    if Lp != L:
        x = jnp.pad(x, ((0, 0), (0, 0), (0, Lp - L)))

    x2d = x.reshape(N, 2 * Lp)  # free reshape (merges contiguous trailing dims)

    tn = _pick_tile_n(N, Lp)
    grid = (pl.cdiv(N, tn),)

    out2d = pl.pallas_call(
        combine_cov_kernel,
        out_shape=jax.ShapeDtypeStruct((N, 2 * Lp), jnp.float32),
        grid=grid,
        in_specs=[
            pl.BlockSpec(memory_space=pltpu.MemorySpace.SMEM),   # weights (12,)
            pl.BlockSpec(memory_space=pltpu.MemorySpace.SMEM),   # bias (2,)
            # NOTE: must span the full 2*Lp lane extent (see invariant above).
            pl.BlockSpec((tn, 2 * Lp), lambda i: (i, 0)),        # x tile
        ],
        out_specs=pl.BlockSpec((tn, 2 * Lp), lambda i: (i, 0)),
        compiler_params=pltpu.CompilerParams(
            dimension_semantics=("parallel",),     # shard batch over v7x's 2 TCs
            vmem_limit_bytes=40 * 1024 * 1024,     # fits v7x 64 MiB physical
        ),
    )(weight.reshape(-1).astype(jnp.float32), bias.astype(jnp.float32), x2d)

    out = out2d.reshape(N, 2, Lp)
    if Lp != L:
        out = out[:, :, :L]
    return out


def reference(x, weight, bias):
    # Pure-JAX reference for sanity check.
    xpad = jnp.pad(x, ((0, 0), (0, 0), (1, 1)))
    L = x.shape[2]
    outs = []
    for oc in range(2):
        acc = jnp.full((x.shape[0], L), bias[oc], dtype=jnp.float32)
        for ic in range(2):
            for k in range(3):
                acc = acc + weight[oc, ic, k] * xpad[:, ic, k:k + L]
        y = jnp.where(acc > 0, acc, NEG_SLOPE * acc)
        outs.append(y[:, None, :])
    return x + jnp.concatenate(outs, axis=1)


if __name__ == "__main__":
    key = jax.random.PRNGKey(0)
    kx, kw1, kb1, kw2, kb2 = jax.random.split(key, 5)

    N, C, L = 4, 2, 128
    x = jax.random.normal(kx, (N, C, L), dtype=jnp.float32)

    # Deterministic parameter init (Conv1d weight: (out=1, in=2, k=3), bias: (1,))
    w1 = jax.random.normal(kw1, (1, 2, 3), dtype=jnp.float32) * 0.1
    b1 = jax.random.normal(kb1, (1,), dtype=jnp.float32) * 0.1
    w2 = jax.random.normal(kw2, (1, 2, 3), dtype=jnp.float32) * 0.1
    b2 = jax.random.normal(kb2, (1,), dtype=jnp.float32) * 0.1

    # Pack both branches: weight (2, 2, 3), bias (2,)
    weight = jnp.concatenate([w1, w2], axis=0)
    bias = jnp.concatenate([b1, b2], axis=0)

    out = combine_cov(x, weight, bias)
    out = jax.block_until_ready(out)

    ref = reference(x, weight, bias)
    assert out.shape == (N, C, L)
    assert jnp.allclose(out, ref, atol=1e-5, rtol=1e-5), "mismatch vs reference"

    print("KERNEL_OK")
</pallas_src>

<mosaic_0001>
module attributes {stable_mosaic.version = 11 : i64} {
  func.func @combine_cov_kernel(%arg0: i32, %arg1: memref<12xf32, #tpu.memory_space<smem>>, %arg2: memref<2xf32, #tpu.memory_space<smem>>, %arg3: memref<4x256xf32, #tpu.memory_space<vmem>>, %arg4: memref<4x256xf32, #tpu.memory_space<vmem>>) attributes {dimension_semantics = [#tpu.dimension_semantics<parallel>], iteration_bounds = array<i64: 1>, scalar_prefetch = 0 : i64, scratch_operands = 0 : i64, tpu.core_type = #tpu.core_type<tc>, window_params = [{transform_indices = @transform_0, window_bounds = array<i64: 12>}, {transform_indices = @transform_1, window_bounds = array<i64: 2>}, {transform_indices = @transform_2, window_bounds = array<i64: 4, 256>}, {transform_indices = @transform_3, window_bounds = array<i64: 4, 256>}]} {
    %c0 = arith.constant 0 : index
    %c0_0 = arith.constant 0 : index
    %0 = vector.load %arg3[%c0, %c0_0] : memref<4x256xf32, #tpu.memory_space<vmem>>, vector<4x256xf32>
    %1 = tpu.iota {dimensions = array<i32: 1>} : vector<1x256xi32>
    %c0_i32 = arith.constant 0 : i32
    %2 = vector.broadcast %c0_i32 : i32 to vector<1x256xi32>
    %3 = arith.cmpi eq, %1, %2 : vector<1x256xi32>
    %c128_i32 = arith.constant 128 : i32
    %4 = vector.broadcast %c128_i32 : i32 to vector<1x256xi32>
    %5 = arith.cmpi eq, %1, %4 : vector<1x256xi32>
    %6 = arith.ori %3, %5 : vector<1x256xi1>
    %cst = arith.constant 0.000000e+00 : f32
    %cst_1 = arith.constant 1.000000e+00 : f32
    %7 = vector.broadcast %cst : f32 to vector<1x256xf32>
    %8 = vector.broadcast %cst_1 : f32 to vector<1x256xf32>
    %9 = arith.select %6, %7, %8 : vector<1x256xi1>, vector<1x256xf32>
    %c127_i32 = arith.constant 127 : i32
    %10 = vector.broadcast %c127_i32 : i32 to vector<1x256xi32>
    %11 = arith.cmpi eq, %1, %10 : vector<1x256xi32>
    %c255_i32 = arith.constant 255 : i32
    %12 = vector.broadcast %c255_i32 : i32 to vector<1x256xi32>
    %13 = arith.cmpi eq, %1, %12 : vector<1x256xi32>
    %14 = arith.ori %11, %13 : vector<1x256xi1>
    %cst_2 = arith.constant 0.000000e+00 : f32
    %cst_3 = arith.constant 1.000000e+00 : f32
    %15 = vector.broadcast %cst_2 : f32 to vector<1x256xf32>
    %16 = vector.broadcast %cst_3 : f32 to vector<1x256xf32>
    %17 = arith.select %14, %15, %16 : vector<1x256xi1>, vector<1x256xf32>
    %c1_i32 = arith.constant 1 : i32
    %18 = tpu.dynamic_rotate %0 by %c1_i32 dim 1 : vector<4x256xf32>, i32 -> vector<4x256xf32>
    %19 = vector.broadcast %9 : vector<1x256xf32> to vector<4x256xf32>
    %20 = arith.mulf %18, %19 : vector<4x256xf32>
    %c255_i32_4 = arith.constant 255 : i32
    %21 = tpu.dynamic_rotate %0 by %c255_i32_4 dim 1 : vector<4x256xf32>, i32 -> vector<4x256xf32>
    %22 = vector.broadcast %17 : vector<1x256xf32> to vector<4x256xf32>
    %23 = arith.mulf %21, %22 : vector<4x256xf32>
    %24 = vector.extract_strided_slice %0 {offsets = [0, 0], sizes = [4, 128], strides = [1, 1]} : vector<4x256xf32> to vector<4x128xf32>
    %25 = vector.extract_strided_slice %0 {offsets = [0, 128], sizes = [4, 128], strides = [1, 1]} : vector<4x256xf32> to vector<4x128xf32>
    %26 = vector.extract_strided_slice %20 {offsets = [0, 0], sizes = [4, 128], strides = [1, 1]} : vector<4x256xf32> to vector<4x128xf32>
    %27 = vector.extract_strided_slice %20 {offsets = [0, 128], sizes = [4, 128], strides = [1, 1]} : vector<4x256xf32> to vector<4x128xf32>
    %28 = vector.extract_strided_slice %23 {offsets = [0, 0], sizes = [4, 128], strides = [1, 1]} : vector<4x256xf32> to vector<4x128xf32>
    %29 = vector.extract_strided_slice %23 {offsets = [0, 128], sizes = [4, 128], strides = [1, 1]} : vector<4x256xf32> to vector<4x128xf32>
    %c0_5 = arith.constant 0 : index
    %30 = memref.load %arg1[%c0_5] : memref<12xf32, #tpu.memory_space<smem>>
    %31 = vector.broadcast %30 : f32 to vector<4x128xf32>
    %32 = arith.mulf %31, %26 : vector<4x128xf32>
    %c1 = arith.constant 1 : index
    %33 = memref.load %arg1[%c1] : memref<12xf32, #tpu.memory_space<smem>>
    %34 = vector.broadcast %33 : f32 to vector<4x128xf32>
    %35 = arith.mulf %34, %24 : vector<4x128xf32>
    %36 = arith.addf %32, %35 : vector<4x128xf32>
    %c2 = arith.constant 2 : index
    %37 = memref.load %arg1[%c2] : memref<12xf32, #tpu.memory_space<smem>>
    %38 = vector.broadcast %37 : f32 to vector<4x128xf32>
    %39 = arith.mulf %38, %28 : vector<4x128xf32>
    %40 = arith.addf %36, %39 : vector<4x128xf32>
    %c3 = arith.constant 3 : index
    %41 = memref.load %arg1[%c3] : memref<12xf32, #tpu.memory_space<smem>>
    %42 = vector.broadcast %41 : f32 to vector<4x128xf32>
    %43 = arith.mulf %42, %27 : vector<4x128xf32>
    %44 = arith.addf %40, %43 : vector<4x128xf32>
    %c4 = arith.constant 4 : index
    %45 = memref.load %arg1[%c4] : memref<12xf32, #tpu.memory_space<smem>>
    %46 = vector.broadcast %45 : f32 to vector<4x128xf32>
    %47 = arith.mulf %46, %25 : vector<4x128xf32>
    %48 = arith.addf %44, %47 : vector<4x128xf32>
    %c5 = arith.constant 5 : index
    %49 = memref.load %arg1[%c5] : memref<12xf32, #tpu.memory_space<smem>>
    %50 = vector.broadcast %49 : f32 to vector<4x128xf32>
    %51 = arith.mulf %50, %29 : vector<4x128xf32>
    %52 = arith.addf %48, %51 : vector<4x128xf32>
    %c0_6 = arith.constant 0 : index
    %53 = memref.load %arg2[%c0_6] : memref<2xf32, #tpu.memory_space<smem>>
    %54 = vector.broadcast %53 : f32 to vector<4x128xf32>
    %55 = arith.addf %52, %54 : vector<4x128xf32>
    %cst_7 = arith.constant 0.00999999977 : f32
    %56 = vector.broadcast %cst_7 : f32 to vector<4x128xf32>
    %57 = arith.mulf %56, %55 : vector<4x128xf32>
    %58 = arith.maximumf %55, %57 : vector<4x128xf32>
    %59 = arith.addf %24, %58 : vector<4x128xf32>
    %c0_8 = arith.constant 0 : index
    %c0_9 = arith.constant 0 : index
    %60 = vector.load %arg4[%c0_8, %c0_9] : memref<4x256xf32, #tpu.memory_space<vmem>>, vector<4x128xf32>
    tpu.vector_store %arg4[%c0_8, %c0_9], %59 {strides = array<i32>} : memref<4x256xf32, #tpu.memory_space<vmem>>, vector<4x128xf32>,
    %c6 = arith.constant 6 : index
    %61 = memref.load %arg1[%c6] : memref<12xf32, #tpu.memory_space<smem>>
    %62 = vector.broadcast %61 : f32 to vector<4x128xf32>
    %63 = arith.mulf %62, %26 : vector<4x128xf32>
    %c7 = arith.constant 7 : index
    %64 = memref.load %arg1[%c7] : memref<12xf32, #tpu.memory_space<smem>>
    %65 = vector.broadcast %64 : f32 to vector<4x128xf32>
    %66 = arith.mulf %65, %24 : vector<4x128xf32>
    %67 = arith.addf %63, %66 : vector<4x128xf32>
    %c8 = arith.constant 8 : index
    %68 = memref.load %arg1[%c8] : memref<12xf32, #tpu.memory_space<smem>>
    %69 = vector.broadcast %68 : f32 to vector<4x128xf32>
    %70 = arith.mulf %69, %28 : vector<4x128xf32>
    %71 = arith.addf %67, %70 : vector<4x128xf32>
    %c9 = arith.constant 9 : index
    %72 = memref.load %arg1[%c9] : memref<12xf32, #tpu.memory_space<smem>>
    %73 = vector.broadcast %72 : f32 to vector<4x128xf32>
    %74 = arith.mulf %73, %27 : vector<4x128xf32>
    %75 = arith.addf %71, %74 : vector<4x128xf32>
    %c10 = arith.constant 10 : index
    %76 = memref.load %arg1[%c10] : memref<12xf32, #tpu.memory_space<smem>>
    %77 = vector.broadcast %76 : f32 to vector<4x128xf32>
    %78 = arith.mulf %77, %25 : vector<4x128xf32>
    %79 = arith.addf %75, %78 : vector<4x128xf32>
    %c11 = arith.constant 11 : index
    %80 = memref.load %arg1[%c11] : memref<12xf32, #tpu.memory_space<smem>>
    %81 = vector.broadcast %80 : f32 to vector<4x128xf32>
    %82 = arith.mulf %81, %29 : vector<4x128xf32>
    %83 = arith.addf %79, %82 : vector<4x128xf32>
    %c1_10 = arith.constant 1 : index
    %84 = memref.load %arg2[%c1_10] : memref<2xf32, #tpu.memory_space<smem>>
    %85 = vector.broadcast %84 : f32 to vector<4x128xf32>
    %86 = arith.addf %83, %85 : vector<4x128xf32>
    %cst_11 = arith.constant 0.00999999977 : f32
    %87 = vector.broadcast %cst_11 : f32 to vector<4x128xf32>
    %88 = arith.mulf %87, %86 : vector<4x128xf32>
    %89 = arith.maximumf %86, %88 : vector<4x128xf32>
    %90 = arith.addf %25, %89 : vector<4x128xf32>
    %c0_12 = arith.constant 0 : index
    %c128 = arith.constant 128 : index
    %91 = vector.load %arg4[%c0_12, %c128] : memref<4x256xf32, #tpu.memory_space<vmem>>, vector<4x128xf32>
    tpu.vector_store %arg4[%c0_12, %c128], %90 {strides = array<i32>} : memref<4x256xf32, #tpu.memory_space<vmem>>, vector<4x128xf32>,
    return
  }
  func.func @transform_0(%arg0: i32) -> i32 {
    %c0_i32 = arith.constant 0 : i32
    %c0_i32_0 = arith.constant 0 : i32
    return %c0_i32 : i32
  }
  func.func @transform_1(%arg0: i32) -> i32 {
    %c0_i32 = arith.constant 0 : i32
    %c0_i32_0 = arith.constant 0 : i32
    return %c0_i32 : i32
  }
  func.func @transform_2(%arg0: i32) -> (i32, i32) {
    %c0_i32 = arith.constant 0 : i32
    %c0_i32_0 = arith.constant 0 : i32
    return %arg0, %c0_i32 : i32, i32
  }
  func.func @transform_3(%arg0: i32) -> (i32, i32) {
    %c0_i32 = arith.constant 0 : i32
    %c0_i32_0 = arith.constant 0 : i32
    return %arg0, %c0_i32 : i32, i32
  }
}

</mosaic_0001>

<bundles_post_ra>
// kernel: tpu_custom_call.1
= control target key start
LH: loop header
LB: loop body
LE: loop exit
PB: predicated region body
PF: predicated region fallthrough
CT: control target
= control target key end

     0   :  { %8 = vsyncpa [#allocation5], 0  ;;  %s381_s0 = inlined_call_operand.hbm [shape: f32[12], index: 0, kind: input, shape index: {}]   ;;  %s382_s1 = inlined_call_operand.vmem [shape: f32[2], index: 1, kind: input, shape index: {}]   ;;  %s383_s2 = inlined_call_operand.hbm [shape: f32[4,256], index: 2, kind: input, shape index: {}]   ;;  %s384_s3 = inlined_call_operand.hbm [shape: f32[4,256], index: 3, kind: output, shape index: {}]  }
   0x1   :  { %9 = vsyncpa [#allocation6], 0 }
   0x2   :  { %10 = vsyncpa [#allocation3], 0 }
   0x3   :  { %11 = vsyncpa [#allocation4], 0  ;;  %s26_s14 = sshll.u32 %s382_s1, 4  ;;  %s190_s17 = scalar_lea.hbm %s381_s0, 16  ;;  %s27_s14 = int_to_ptr.vmem [resolvable:$true] %s26_s14 }
   0x4   :  { %p191_p0 = scmp.ne.s32.totalorder %s381_s0, %s190_s17  ;;  %p194_p1 = scmp.lt.u32.totalorder %s190_s17, %s381_s0 }
   0x6   :  { %p196_p2 = pnand %p194_p1, %p191_p0 }
   0x8   :  { %199 = shalt.err (!%p196_p2)
}
   0x9   :  { %s264_s22 = smov [#allocation2]   ;;  %s200_s1 = scalar_lea.vmem %s27_s14, 16 }
   0xa   :  { %19 = dma.hbm_to_smem %s381_s0, 16, %s264_s22, [#allocation5]  }
   0xb   :  { %p201_p3 = scmp.ne.s32.totalorder %s27_s14, %s200_s1  ;;  %p205_p4 = scmp.lt.s32.totalorder %s27_s14, %s27_s14 }
   0xc   :  { %p206_p5 = scmp.lt.s32.totalorder %s200_s1, %s200_s1 }
   0xe   :  { %p207_p6 = por %p206_p5, %p205_p4 }
  0x10   :  { %p208_p7 = pnand %p207_p6, %p201_p3 }
  0x12   :  { %211 = shalt.err (!%p208_p7)
}
  0x13   :  { %s265_s25 = smov [#allocation7]   ;;  %s266_s26 = smov [#allocation8]  }
  0x14   :  { %29 = dma.vmem_to_smem %s27_s14, 16, %s265_s25, [#allocation6]  }
  0x15   :  { %s36_s27 = sshll.u32 %s266_s26, 4  ;;  %s212_s30 = scalar_lea.hbm %s383_s2, 128  ;;  %s37_s27 = int_to_ptr.vmem [resolvable:$true] %s36_s27 }
  0x16   :  { %p213_p8 = scmp.ne.s32.totalorder %s383_s2, %s212_s30  ;;  %p216_p9 = scmp.lt.u32.totalorder %s212_s30, %s383_s2 }
  0x18   :  { %p218_p10 = pnand %p216_p9, %p213_p8 }
  0x1a   :  { %221 = shalt.err (!%p218_p10)
}
  0x1b   :  { %s222_s7 = scalar_lea.vmem %s37_s27, 128  ;;  %p227_p12 = scmp.lt.s32.totalorder %s37_s27, %s37_s27 }
  0x1c   :  { %p223_p11 = scmp.ne.s32.totalorder %s37_s27, %s222_s7  ;;  %p228_p13 = scmp.lt.s32.totalorder %s222_s7, %s222_s7 }
  0x1e   :  { %p229_p0 = por %p228_p13, %p227_p12 }
  0x20   :  { %p230_p1 = pnand %p229_p0, %p223_p11 }
  0x22   :  { %233 = shalt.err (!%p230_p1)
}
  0x23   :  { %39 = dma.hbm_to_vmem [thread:$0]  %s383_s2, 128, %s37_s27, [#allocation3]  }
  0x24   :  { %256 = dma.done.wait [#allocation5], 16  }
  0x25   :  { %257 = vsyncadd [#allocation5], 4294967280 }
  0x26   :  { %258 = dma.done.wait [#allocation6], 16  }
  0x27   :  { %259 = vsyncadd [#allocation6], 4294967280 }
  0x28   :  { %260 = dma.done.wait [#allocation3], 128  }
  0x29   :  { %261 = vsyncadd [#allocation3], 4294967168 }
  0x2a   :  { %49 = sfence }
  0x2b   :  { %v318_v0 = vld [vmem:[#allocation8] sm:$0xff]  ;;  %s267_s10 = smov 127   ;;  %s268_s11 = smov 1   ;;  %v51_v2 = vlaneseq  ;;  %v269_v7 = vmov 1.0  }
  0x2c   :  { %82 = vrot.lane.b32.xlu1 %v318_v0, %s267_s10  ;;  %73 = vrot.lane.b32.xlu0 %v318_v0, %s268_s11  ;;  %v71_v1 = vcombine.high %v318_v0, %v318_v0  ;;  %s324_s2 = sld [smem:[#allocation2 + $0x1]]  ;;  %s326_s12 = sld [smem:[#allocation2 + $0x7]]  ;;  %v108_v17 = vrot.slane %v318_v0, 4 }
  0x2d   :  { %v52_v3 = vand.u32 127, %v51_v2  ;;  %s328_s13 = sld [smem:[#allocation2]]  ;;  %s330_s14 = sld [smem:[#allocation2 + $0x6]] }
  0x2e   :  { %s332_s15 = sld [smem:[#allocation2 + $0x2]]  ;;  %s334_s16 = sld [smem:[#allocation2 + $0x8]] }
  0x2f   :  { %v53_v4 = vadd.s32 128, %v52_v3  ;;  %vm54_vm0 = vcmp.eq.s32.totalorder %v52_v3, 0  ;;  %s336_s17 = sld [smem:[#allocation2 + $0x4]]  ;;  %s338_s18 = sld [smem:[#allocation2 + $0xa]]  ;;  %vm62_vm1 = vcmp.eq.s32.totalorder %v52_v3, 127  ;;  %vm86_vm2 = vcmp.lt.s32.totalorder %v52_v3, 127 }
  0x30   :  { %84 = vrot.lane.b32.xlu1 %v71_v1, %s267_s10  ;;  %75 = vrot.lane.b32.xlu0 %v71_v1, %s268_s11  ;;  %vm77_vm4 = vcmp.lt.s32.totalorder %v52_v3, 1  ;;  %s340_s19 = sld [smem:[#allocation2 + $0x3]]  ;;  %s342_s20 = sld [smem:[#allocation2 + $0x9]]  ;;  %v60_v8 = vsel %vm54_vm0, 0.0, %v269_v7  ;;  %v68_v9 = vsel %vm62_vm1, 0.0, %v269_v7 }
  0x31   :  { %vm57_vm3 = vcmp.eq.s32.totalorder %v53_v4, 128  ;;  %vm65_vm5 = vcmp.eq.s32.totalorder %v53_v4, 255  ;;  %s349_s21 = sld [smem:[#allocation2 + $0x5]]  ;;  %s351_s22 = sld [smem:[#allocation2 + $0xb]] }
  0x32   :  { %v95_v11 = vstv %s324_s2  ;;  %v127_v12 = vstv %s326_s12  ;;  %v61_v15 = vsel %vm57_vm3, 0.0, %v269_v7  ;;  %v69_v22 = vsel %vm65_vm5, 0.0, %v269_v7  ;;  %s116_s23 = sld [smem:[#allocation7]]  ;;  %s181_s24 = sld [smem:[#allocation7 + $0x1]] }
  0x33   :  { %v92_v18 = vstv %s328_s13  ;;  %v124_v19 = vstv %s330_s14  ;;  %v96_v24 = vmul.f32 %v95_v11, %v318_v0  ;;  %v128_v25 = vmul.f32 %v127_v12, %v318_v0  ;;  %s270_s1 = smov [#allocation9]  }
  0x34   :  { %v99_v26 = vstv %s332_s15  ;;  %v131_v27 = vstv %s334_s16  ;;  %s159_s25 = sshll.u32 %s270_s1, 4  ;;  %s160_s25 = int_to_ptr.vmem [resolvable:$true] %s159_s25 }
  0x35   :  { %v107_v28 = vstv %s336_s17  ;;  %v139_v29 = vstv %s338_s18  ;;  %s234_s26 = scalar_lea.vmem %s160_s25, 128  ;;  %p239_p3 = scmp.lt.s32.totalorder %s160_s25, %s160_s25 }
  0x36   :  { %v103_v34 = vstv %s340_s19  ;;  %v135_v35 = vstv %s342_s20  ;;  %v110_v41 = vmul.f32 %v108_v17, %v107_v28  ;;  %v140_v42 = vmul.f32 %v139_v29, %v108_v17  ;;  %p235_p2 = scmp.ne.s32.totalorder %s160_s25, %s234_s26  ;;  %p240_p4 = scmp.lt.s32.totalorder %s234_s26, %s234_s26 }
  0x37   :  { %v113_v47 = vstv %s349_s21  ;;  %v143_v48 = vstv %s351_s22 }
  0x38   :  { %v117_v55 = vstv %s116_s23  ;;  %v147_v56 = vstv %s181_s24  ;;  %p241_p5 = por %p240_p4, %p239_p3 }
  0x3a   :  { %p242_p6 = pnand %p241_p5, %p235_p2 }
  0x9e   :  { %v83_v5 = vpop.permute.xlu1 %82  ;;  %v74_v6 = vpop.permute.xlu0 %73 }
  0xa2   :  { %v85_v10 = vpop.permute.xlu1 %84  ;;  %v76_v13 = vpop.permute.xlu0 %75 }
  0xa3   :  { %v87_v14 = vsel %vm86_vm2, %v83_v5, %v85_v10  ;;  %v79_v16 = vsel %vm77_vm4, %v76_v13, %v74_v6  ;;  %v78_v20 = vsel %vm77_vm4, %v74_v6, %v76_v13  ;;  %v88_v30 = vsel %vm86_vm2, %v85_v10, %v83_v5 }
  0xa4   :  { %v80_v21 = vmul.f32 %v79_v16, %v60_v8  ;;  %v89_v23 = vmul.f32 %v87_v14, %v68_v9  ;;  %v81_v31 = vmul.f32 %v78_v20, %v61_v15  ;;  %v90_v40 = vmul.f32 %v88_v30, %v69_v22 }
  0xa6   :  { %v93_v32 = vmul.f32 %v92_v18, %v80_v21  ;;  %v125_v33 = vmul.f32 %v124_v19, %v80_v21  ;;  %v100_v36 = vmul.f32 %v99_v26, %v89_v23  ;;  %v132_v37 = vmul.f32 %v131_v27, %v89_v23 }
  0xa7   :  { %v104_v44 = vmul.f32 %v103_v34, %v81_v31  ;;  %v136_v46 = vmul.f32 %v135_v35, %v81_v31  ;;  %v114_v51 = vmul.f32 %v113_v47, %v90_v40  ;;  %v144_v52 = vmul.f32 %v143_v48, %v90_v40 }
  0xa8   :  { %v97_v38 = vadd.f32 %v96_v24, %v93_v32  ;;  %v129_v39 = vadd.f32 %v128_v25, %v125_v33 }
  0xaa   :  { %v101_v43 = vadd.f32 %v100_v36, %v97_v38  ;;  %v133_v45 = vadd.f32 %v132_v37, %v129_v39 }
  0xac   :  { %v105_v49 = vadd.f32 %v104_v44, %v101_v43  ;;  %v137_v50 = vadd.f32 %v136_v46, %v133_v45 }
  0xae   :  { %v111_v53 = vadd.f32 %v110_v41, %v105_v49  ;;  %v141_v54 = vadd.f32 %v140_v42, %v137_v50 }
  0xb0   :  { %v115_v57 = vadd.f32 %v114_v51, %v111_v53  ;;  %v145_v58 = vadd.f32 %v144_v52, %v141_v54 }
  0xb2   :  { %v118_v59 = vadd.f32 %v117_v55, %v115_v57  ;;  %v148_v60 = vadd.f32 %v147_v56, %v145_v58 }
  0xb4   :  { %v119_v61 = vmul.f32 0.01, %v118_v59  ;;  %v149_v62 = vmul.f32 0.01, %v148_v60 }
  0xb6   :  { %v120_v63 = vmax.f32 %v118_v59, %v119_v61  ;;  %v150_v1 = vmax.f32 %v148_v60, %v149_v62 }
  0xb8   :  { %v121_v2 = vadd.f32 %v120_v63, %v318_v0  ;;  %v151_v3 = vadd.f32 %v150_v1, %v108_v17 }
  0xba   :  { %122 = vst [vmem:[#allocation9] sm:$0xf] %v121_v2  ;;  %152 = vst [vmem:[#allocation9 + $0x4] sm:$0xf] %v151_v3 }
  0xbb   :  { %245 = shalt.err (!%p242_p6)
}
  0xbc   :  { %s246_s29 = scalar_lea.hbm %s384_s3, 128 }
  0xbd   :  { %p247_p7 = scmp.ne.s32.totalorder %s384_s3, %s246_s29  ;;  %p250_p8 = scmp.lt.u32.totalorder %s246_s29, %s384_s3 }
  0xbf   :  { %p252_p9 = pnand %p250_p8, %p247_p7 }
  0xc1   :  { %255 = shalt.err (!%p252_p9)
}
  0xc2   :  { %162 = dma.vmem_to_hbm [thread:$0]  %s160_s25, 128, %s384_s3, [#allocation4]  }
  0xc3   :  { %262 = dma.done.wait [#allocation4], 128  }
  0xc4   :  { %263 = vsyncadd [#allocation4], 4294967168 }
  0xc5   :  { %166 = vsyncpa [#allocation3], 1 }
  0xc6   :  { %167 = vsyncpa [#allocation4], 1 }
  0xc7   :  { %168 = vsyncpa [#allocation5], 1 }
  0xc8   :  { %169 = vsyncpa [#allocation6], 1 }

</bundles_post_ra>
